<compile_context>
chip_gen: v7x
topology: tpu7x:2x2x1
jax: 0.10.0
libtpu: 0.0.40
codegen_flags: <defaults>
</compile_context>

<pallas_src>
import functools

import numpy as np
import jax
import jax.numpy as jnp
from jax.experimental import pallas as pl
from jax.experimental.pallas import tpu as pltpu


def _round_up(n, m):
    return ((n + m - 1) // m) * m


def _windowed_nerf_kernel(x_ref, chan_ref, scale_ref, phase_ref, gain_ref, o_ref,
                          *, D, F, include_input):
    # x_ref:     (D, tn)       points, channel-major (lanes = points)
    # chan_ref:  (2DF, 1) i32  input channel feeding output row k (final row order)
    # scale_ref: (2DF, 1) f32  2*pi*freq for row k (2*pi folded at trace time)
    # phase_ref: (2DF, 1) f32  0 for sin rows, pi/2 for cos rows
    # gain_ref:  (2DF, 1) f32  cosine-easing window gain (runtime, derived from alpha)
    # o_ref:     (out_dim, tn) rows: [sin(d,f) | cos(d,f) | identity (optional)], final order
    DF2 = 2 * D * F

    x = x_ref[...]                                   # (D, tn)
    chan = chan_ref[...]                             # (2DF, 1)

    # Channel-replicated argument block in FINAL row order via (D-1) broadcast selects.
    rep = x[D - 1:D, :]                              # (1, tn)
    for d in range(D - 2, -1, -1):
        rep = jnp.where(chan == d, x[d:d + 1, :], rep)

    # ONE sin over the dense (2DF, tn) block, windowed, then ONE aligned store.
    enc = jnp.sin(rep * scale_ref[...] + phase_ref[...]) * gain_ref[...]   # (2DF, tn)
    o_ref[pl.ds(0, DF2), :] = enc.astype(o_ref.dtype)

    if include_input:
        o_ref[pl.ds(DF2, D), :] = ((x - 0.5) * 2.0).astype(o_ref.dtype)


@functools.partial(
    jax.jit,
    static_argnames=("in_dim", "num_frequencies", "min_freq", "max_freq",
                     "include_input", "channel_major", "out_dtype", "tn_target"))
def _windowed_nerf_forward(x_flat, alpha, num_base, *, in_dim, num_frequencies,
                           min_freq, max_freq, include_input, channel_major=False,
                           out_dtype=jnp.float32, tn_target=32768):
    D, F = in_dim, num_frequencies
    DF, DF2 = D * F, 2 * D * F
    out_dim = DF2 + (D if include_input else 0)
    n = x_flat.shape[0]

    # ---- static per-row vectors (trace-time numpy, passed as kernel operands) ----
    freqs = (2.0 ** np.linspace(min_freq, max_freq, F)).astype(np.float64)
    k = np.arange(DF2)
    scale = (2.0 * np.pi * freqs)[k % F].reshape(DF2, 1).astype(np.float32)
    phase = np.where(k < DF, 0.0, np.pi / 2.0).reshape(DF2, 1).astype(np.float32)
    chan = ((k % DF) // F).astype(np.int32).reshape(DF2, 1)

    # ---- runtime window gain (alpha / num_base traced -> no retrace on schedule updates) ----
    bands = jnp.arange(F, dtype=jnp.float32) - num_base
    window = 0.5 * (1.0 + jnp.cos(np.pi * jnp.clip(alpha - bands, 0.0, 1.0) + np.pi))  # (F,)
    # PyTorch indexes the window through a (D, F, 2) reshape of the [all-sin | all-cos]
    # feature vector, i.e. flat row k gets window[(k % (2F)) // 2].  Reproduce exactly.
    gain = window[(k % (2 * F)) // 2].astype(jnp.float32).reshape(DF2, 1)

    # ---- tiling: lane-dense point tiles; >= 4 grid steps when possible (v7x: 2 TensorCores) ----
    blocks = max(pl.cdiv(max(n, 1), tn_target), min(4, pl.cdiv(max(n, 1), 128)))
    tn = _round_up(pl.cdiv(max(n, 1), blocks), 128)
    n_pad = _round_up(max(n, 1), tn)

    xt = jnp.transpose(x_flat.astype(jnp.float32))            # (D, n) channel-major
    if n_pad != n:
        xt = jnp.pad(xt, ((0, 0), (0, n_pad - n)))            # padded points are benign

    kernel = functools.partial(_windowed_nerf_kernel, D=D, F=F, include_input=include_input)
    small = pl.BlockSpec((DF2, 1), lambda i: (0, 0))

    out_t = pl.pallas_call(
        kernel,
        out_shape=jax.ShapeDtypeStruct((out_dim, n_pad), out_dtype),
        grid=(n_pad // tn,),
        in_specs=[pl.BlockSpec((D, tn), lambda i: (0, i)), small, small, small, small],
        out_specs=pl.BlockSpec((out_dim, tn), lambda i: (0, i)),
        compiler_params=pltpu.CompilerParams(dimension_semantics=("parallel",)),
    )(xt, chan, scale, phase, gain)

    out_t = out_t[:, :n]
    if channel_major:
        # Consumers that can take the encoding channel-major (or fold the transpose into their
        # first matmul's weights) should use this path and skip the full-tensor transpose below.
        return out_t                                           # (out_dim, n)
    return jnp.transpose(out_t)                                # (n, out_dim)


class WindowedNeRFEncodingPallas:
    """Pallas-backed equivalent of WindowedNeRFEncoding.forward (covs=None path)."""

    def __init__(self, in_dim, num_frequencies, min_freq_exp, max_freq_exp,
                 include_input=False, out_dtype=jnp.float32):
        self.in_dim = int(in_dim)
        self.num_frequencies = int(num_frequencies)
        self.min_freq = float(min_freq_exp)
        self.max_freq = float(max_freq_exp)
        self.include_input = bool(include_input)
        self.out_dtype = out_dtype                 # bf16 halves store/transpose bytes on v5e
        # buffers (deterministic init, matching the PyTorch module defaults)
        self.alpha = 0.0
        self.num_base_frequencies = 0.0

    def register_alpha(self, alpha):
        self.alpha = float(alpha)                  # runtime arg: no retrace on change

    def register_num_base_frequencies(self, n):
        self.num_base_frequencies = float(n)

    def get_out_dim(self):
        out = self.in_dim * self.num_frequencies * 2
        if self.include_input:
            out += self.in_dim
        return out

    def __call__(self, in_tensor):
        # TODO(synk): `covs` (integrated positional encoding / expected_sin) path not implemented.
        x = jnp.asarray(in_tensor, jnp.float32)
        lead = x.shape[:-1]
        xf = x.reshape(-1, self.in_dim)
        out = _windowed_nerf_forward(
            xf, jnp.float32(self.alpha), jnp.float32(self.num_base_frequencies),
            in_dim=self.in_dim, num_frequencies=self.num_frequencies,
            min_freq=self.min_freq, max_freq=self.max_freq,
            include_input=self.include_input, out_dtype=self.out_dtype)
        return out.reshape(*lead, self.get_out_dim())


# ---- pure-JAX reference mirroring the PyTorch module (for correctness check) ----
def reference_forward(x, in_dim, F, min_freq, max_freq, include_input, alpha, num_base):
    x = jnp.asarray(x, jnp.float32)
    orig = (x - 0.5) * 2.0
    xs = 2.0 * np.pi * x
    freqs = jnp.asarray((2.0 ** np.linspace(min_freq, max_freq, F)).astype(np.float32))
    scaled = (xs[..., None] * freqs).reshape(*x.shape[:-1], in_dim * F)
    enc = jnp.sin(jnp.concatenate([scaled, scaled + np.pi / 2.0], axis=-1))
    feat = enc.reshape(*x.shape[:-1], in_dim, F, 2)
    bands = jnp.arange(F, dtype=jnp.float32) - np.float32(num_base)
    window = 0.5 * (1.0 + jnp.cos(np.pi * jnp.clip(np.float32(alpha) - bands, 0.0, 1.0) + np.pi))
    feat = (window.reshape(1, F, 1) * feat).reshape(*x.shape[:-1], -1)
    if include_input:
        return jnp.concatenate([feat, orig], axis=-1)
    return feat


if __name__ == "__main__":
    # small NeRF-like shapes: 2 "rays" x 64 samples x 3-D points
    B, S, D, F = 2, 64, 3, 4
    key = jax.random.PRNGKey(0)
    k1, k2 = jax.random.split(key)
    x = jax.random.uniform(k1, (B, S, D), dtype=jnp.float32)          # in [0, 1)

    enc = WindowedNeRFEncodingPallas(in_dim=D, num_frequencies=F,
                                     min_freq_exp=0.0, max_freq_exp=3.0,
                                     include_input=True)
    enc.register_alpha(2.5)                                           # non-trivial window
    enc.register_num_base_frequencies(0.0)

    out = jax.block_until_ready(enc(x))
    ref = reference_forward(x, D, F, 0.0, 3.0, True, 2.5, 0.0)
    assert out.shape == (B, S, D * F * 2 + D), out.shape
    np.testing.assert_allclose(np.asarray(out), np.asarray(ref), atol=3e-5, rtol=1e-5)

    # alpha changes every step in mip-NeRF schedules: now a runtime arg -> no retrace.
    enc.register_alpha(1.0)
    out_b = jax.block_until_ready(enc(x))
    ref_b = reference_forward(x, D, F, 0.0, 3.0, True, 1.0, 0.0)
    np.testing.assert_allclose(np.asarray(out_b), np.asarray(ref_b), atol=3e-5, rtol=1e-5)

    # second config: no identity append, ragged point count (exercises lane padding),
    # nonzero base frequency.
    x2 = jax.random.uniform(k2, (5, 37, D), dtype=jnp.float32)
    enc2 = WindowedNeRFEncodingPallas(in_dim=D, num_frequencies=F,
                                      min_freq_exp=0.0, max_freq_exp=3.0,
                                      include_input=False)
    enc2.register_alpha(1.2)
    enc2.register_num_base_frequencies(1.0)
    out2 = jax.block_until_ready(enc2(x2))
    ref2 = reference_forward(x2, D, F, 0.0, 3.0, False, 1.2, 1.0)
    assert out2.shape == (5, 37, D * F * 2), out2.shape
    np.testing.assert_allclose(np.asarray(out2), np.asarray(ref2), atol=3e-5, rtol=1e-5)

    print("KERNEL_OK")
</pallas_src>

<mosaic_0001>
module attributes {stable_mosaic.version = 11 : i64} {
  func.func @_windowed_nerf_kernel(%arg0: i32, %arg1: memref<3x128xf32, #tpu.memory_space<vmem>>, %arg2: memref<24x1xi32, #tpu.memory_space<vmem>>, %arg3: memref<24x1xf32, #tpu.memory_space<vmem>>, %arg4: memref<24x1xf32, #tpu.memory_space<vmem>>, %arg5: memref<24x1xf32, #tpu.memory_space<vmem>>, %arg6: memref<27x128xf32, #tpu.memory_space<vmem>>) attributes {dimension_semantics = [#tpu.dimension_semantics<parallel>], iteration_bounds = array<i64: 1>, scalar_prefetch = 0 : i64, scratch_operands = 0 : i64, tpu.core_type = #tpu.core_type<tc>, window_params = [{transform_indices = @transform_0, window_bounds = array<i64: 3, 128>}, {pipeline_mode = #tpu.pipeline_mode<synchronous>, transform_indices = @transform_1, window_bounds = array<i64: 24, 1>}, {pipeline_mode = #tpu.pipeline_mode<synchronous>, transform_indices = @transform_2, window_bounds = array<i64: 24, 1>}, {pipeline_mode = #tpu.pipeline_mode<synchronous>, transform_indices = @transform_3, window_bounds = array<i64: 24, 1>}, {pipeline_mode = #tpu.pipeline_mode<synchronous>, transform_indices = @transform_4, window_bounds = array<i64: 24, 1>}, {transform_indices = @transform_5, window_bounds = array<i64: 27, 128>}]} {
    %c0 = arith.constant 0 : index
    %c0_0 = arith.constant 0 : index
    %0 = vector.load %arg1[%c0, %c0_0] : memref<3x128xf32, #tpu.memory_space<vmem>>, vector<3x128xf32>
    %c0_1 = arith.constant 0 : index
    %c0_2 = arith.constant 0 : index
    %1 = vector.load %arg2[%c0_1, %c0_2] : memref<24x1xi32, #tpu.memory_space<vmem>>, vector<24x1xi32>
    %2 = vector.extract_strided_slice %0 {offsets = [2, 0], sizes = [1, 128], strides = [1, 1]} : vector<3x128xf32> to vector<1x128xf32>
    %c1_i32 = arith.constant 1 : i32
    %3 = vector.broadcast %c1_i32 : i32 to vector<24x1xi32>
    %4 = arith.cmpi eq, %1, %3 : vector<24x1xi32>
    %5 = vector.extract_strided_slice %0 {offsets = [1, 0], sizes = [1, 128], strides = [1, 1]} : vector<3x128xf32> to vector<1x128xf32>
    %6 = vector.shape_cast %4 : vector<24x1xi1> to vector<24x1xi1>
    %7 = vector.broadcast %6 : vector<24x1xi1> to vector<24x128xi1>
    %8 = vector.shape_cast %5 : vector<1x128xf32> to vector<1x128xf32>
    %9 = vector.broadcast %8 : vector<1x128xf32> to vector<24x128xf32>
    %10 = vector.shape_cast %2 : vector<1x128xf32> to vector<1x128xf32>
    %11 = vector.broadcast %10 : vector<1x128xf32> to vector<24x128xf32>
    %12 = arith.select %7, %9, %11 : vector<24x128xi1>, vector<24x128xf32>
    %c0_i32 = arith.constant 0 : i32
    %13 = vector.broadcast %c0_i32 : i32 to vector<24x1xi32>
    %14 = arith.cmpi eq, %1, %13 : vector<24x1xi32>
    %15 = vector.extract_strided_slice %0 {offsets = [0, 0], sizes = [1, 128], strides = [1, 1]} : vector<3x128xf32> to vector<1x128xf32>
    %16 = vector.shape_cast %14 : vector<24x1xi1> to vector<24x1xi1>
    %17 = vector.broadcast %16 : vector<24x1xi1> to vector<24x128xi1>
    %18 = vector.shape_cast %15 : vector<1x128xf32> to vector<1x128xf32>
    %19 = vector.broadcast %18 : vector<1x128xf32> to vector<24x128xf32>
    %20 = arith.select %17, %19, %12 : vector<24x128xi1>, vector<24x128xf32>
    %c0_3 = arith.constant 0 : index
    %c0_4 = arith.constant 0 : index
    %21 = vector.load %arg3[%c0_3, %c0_4] : memref<24x1xf32, #tpu.memory_space<vmem>>, vector<24x1xf32>
    %22 = vector.broadcast %21 : vector<24x1xf32> to vector<24x128xf32>
    %23 = arith.mulf %20, %22 : vector<24x128xf32>
    %c0_5 = arith.constant 0 : index
    %c0_6 = arith.constant 0 : index
    %24 = vector.load %arg4[%c0_5, %c0_6] : memref<24x1xf32, #tpu.memory_space<vmem>>, vector<24x1xf32>
    %25 = vector.broadcast %24 : vector<24x1xf32> to vector<24x128xf32>
    %26 = arith.addf %23, %25 : vector<24x128xf32>
    %27 = math.sin %26 : vector<24x128xf32>
    %c0_7 = arith.constant 0 : index
    %c0_8 = arith.constant 0 : index
    %28 = vector.load %arg5[%c0_7, %c0_8] : memref<24x1xf32, #tpu.memory_space<vmem>>, vector<24x1xf32>
    %29 = vector.broadcast %28 : vector<24x1xf32> to vector<24x128xf32>
    %30 = arith.mulf %27, %29 : vector<24x128xf32>
    %c0_9 = arith.constant 0 : index
    %c0_10 = arith.constant 0 : index
    %31 = vector.load %arg6[%c0_9, %c0_10] : memref<27x128xf32, #tpu.memory_space<vmem>>, vector<24x128xf32>
    tpu.vector_store %arg6[%c0_9, %c0_10], %30 {strides = array<i32>} : memref<27x128xf32, #tpu.memory_space<vmem>>, vector<24x128xf32>,
    %cst = arith.constant 5.000000e-01 : f32
    %32 = vector.broadcast %cst : f32 to vector<3x128xf32>
    %33 = arith.subf %0, %32 : vector<3x128xf32>
    %cst_11 = arith.constant 2.000000e+00 : f32
    %34 = vector.broadcast %cst_11 : f32 to vector<3x128xf32>
    %35 = arith.mulf %33, %34 : vector<3x128xf32>
    %c24 = arith.constant 24 : index
    %c0_12 = arith.constant 0 : index
    %36 = vector.load %arg6[%c24, %c0_12] : memref<27x128xf32, #tpu.memory_space<vmem>>, vector<3x128xf32>
    tpu.vector_store %arg6[%c24, %c0_12], %35 {strides = array<i32>} : memref<27x128xf32, #tpu.memory_space<vmem>>, vector<3x128xf32>,
    return
  }
  func.func @transform_0(%arg0: i32) -> (i32, i32) {
    %c0_i32 = arith.constant 0 : i32
    %c0_i32_0 = arith.constant 0 : i32
    return %c0_i32, %arg0 : i32, i32
  }
  func.func @transform_1(%arg0: i32) -> (i32, i32) {
    %c0_i32 = arith.constant 0 : i32
    %c0_i32_0 = arith.constant 0 : i32
    %c0_i32_1 = arith.constant 0 : i32
    return %c0_i32, %c0_i32_0 : i32, i32
  }
  func.func @transform_2(%arg0: i32) -> (i32, i32) {
    %c0_i32 = arith.constant 0 : i32
    %c0_i32_0 = arith.constant 0 : i32
    %c0_i32_1 = arith.constant 0 : i32
    return %c0_i32, %c0_i32_0 : i32, i32
  }
  func.func @transform_3(%arg0: i32) -> (i32, i32) {
    %c0_i32 = arith.constant 0 : i32
    %c0_i32_0 = arith.constant 0 : i32
    %c0_i32_1 = arith.constant 0 : i32
    return %c0_i32, %c0_i32_0 : i32, i32
  }
  func.func @transform_4(%arg0: i32) -> (i32, i32) {
    %c0_i32 = arith.constant 0 : i32
    %c0_i32_0 = arith.constant 0 : i32
    %c0_i32_1 = arith.constant 0 : i32
    return %c0_i32, %c0_i32_0 : i32, i32
  }
  func.func @transform_5(%arg0: i32) -> (i32, i32) {
    %c0_i32 = arith.constant 0 : i32
    %c0_i32_0 = arith.constant 0 : i32
    return %c0_i32, %arg0 : i32, i32
  }
}

</mosaic_0001>

<bundles_post_ra>
// kernel: _windowed_nerf_forward.1
= control target key start
LH: loop header
LB: loop body
LE: loop exit
PB: predicated region body
PF: predicated region fallthrough
CT: control target
= control target key end

     0   :  { %v549_v3 = vmov 0   ;;  %s876_s0 = inlined_call_operand.vmem [shape: f32[3,128], index: 0, kind: input, shape index: {}]   ;;  %s877_s1 = inlined_call_operand.vmem [shape: s32[24,1], index: 1, kind: input, shape index: {}]   ;;  %s878_s2 = inlined_call_operand.vmem [shape: f32[24,1], index: 2, kind: input, shape index: {}]   ;;  %s879_s3 = inlined_call_operand.vmem [shape: f32[24,1], index: 3, kind: input, shape index: {}]   ;;  %s880_s4 = inlined_call_operand.vmem [shape: f32[24,1], index: 4, kind: input, shape index: {}]   ;;  %s881_s5 = inlined_call_operand.hbm [shape: f32[27,128], index: 5, kind: output, shape index: {}]  }
   0x1   :  { %v24_v0 = vld [vmem:[%s877_s1 + $0x10] sm:$0xff]  ;;  %v22_v1 = vld [vmem:[%s877_s1] sm:$0xff]  ;;  %v23_v2 = vld [vmem:[%s877_s1 + $0x8] sm:$0xff]  ;;  %512 = vset.pattern.permute.xlu1 %v549_v3  ;;  %511 = vset.pattern.permute.xlu0 %v549_v3 }
   0x2   :  { %vm27_vm0 = vcmp.eq.s32.totalorder %v24_v0, 1  ;;  %vm25_vm1 = vcmp.eq.s32.totalorder %v22_v1, 1  ;;  %vm54_vm2 = vcmp.eq.s32.totalorder %v22_v1, 0  ;;  %vm26_vm3 = vcmp.eq.s32.totalorder %v23_v2, 1  ;;  %v21_v8 = vld [vmem:[%s876_s0] sm:$0x7] }
   0x3   :  { %v30_v4 = vsel %vm27_vm0, 1, %v549_v3  ;;  %v28_v5 = vsel %vm25_vm1, 1, %v549_v3  ;;  %v57_v6 = vsel %vm54_vm2, 1, %v549_v3  ;;  %v29_v7 = vsel %vm26_vm3, 1, %v549_v3 }
   0x4   :  { %38 = vperm.xlu1 %512, %v30_v4   ;;  %32 = vperm.xlu0 %511, %v28_v5   ;;  %vm56_vm4 = vcmp.eq.s32.totalorder %v24_v0, 0  ;;  %vm55_vm5 = vcmp.eq.s32.totalorder %v23_v2, 0  ;;  %v488_v9 = vadd.f32 -0.5, %v21_v8 }
   0x5   :  { %10 = vsyncpa [#allocation3], 0  ;;  %v59_v11 = vsel %vm56_vm4, 1, %v549_v3  ;;  %v58_v12 = vsel %vm55_vm5, 1, %v549_v3  ;;  %v80_v13 = vld [vmem:[%s878_s2 + $0x8] sm:$0xff]  ;;  %v79_v14 = vld [vmem:[%s878_s2] sm:$0xff]  ;;  %v43_v22 = vlaneseq }
   0x6   :  { %v458_v10 = vmul.f32 2.0, %v488_v9  ;;  %v100_v15 = vld [vmem:[%s879_s3] sm:$0xff]  ;;  %v81_v16 = vld [vmem:[%s878_s2 + $0x10] sm:$0xff]  ;;  %v101_v18 = vld [vmem:[%s879_s3 + $0x8] sm:$0xff] }
   0x7   :  { %v102_v17 = vld [vmem:[%s879_s3 + $0x10] sm:$0xff]  ;;  %v434_v19 = vld [vmem:[%s880_s4 + $0x8] sm:$0xff]  ;;  %v433_v20 = vld [vmem:[%s880_s4] sm:$0xff]  ;;  %v44_v25 = vshrl.u32 %v43_v22, 7  ;;  %s556_s3 = smov [#allocation2]  }
   0x8   :  { %61 = vperm.xlu1 %512, %v57_v6   ;;  %35 = vperm.xlu0 %511, %v29_v7   ;;  %459 = vst [vmem:[#allocation2 + $0x18] sm:$0x7] %v458_v10  ;;  %v435_v21 = vld [vmem:[%s880_s4 + $0x10] sm:$0xff]  ;;  %s465_s4 = sshll.u32 %s556_s3, 4  ;;  %s466_s4 = int_to_ptr.vmem [resolvable:$true] %s465_s4 }
   0x9   :  { %v45_v28 = vsub.s32 1, %v44_v25  ;;  %v49_v29 = vsub.s32 2, %v44_v25  ;;  %v74_v30 = vsub.s32 0, %v44_v25  ;;  %s525_s16 = scalar_lea.vmem %s466_s4, 512  ;;  %p530_p1 = scmp.lt.s32.totalorder %s466_s4, %s466_s4 }
   0xa   :  { %p526_p0 = scmp.ne.s32.totalorder %s466_s4, %s525_s16  ;;  %p531_p2 = scmp.lt.s32.totalorder %s525_s16, %s525_s16 }
   0xb   :  { %v46_v33 = vrot.slane %v21_v8, %v45_v28  ;;  %v50_v34 = vrot.slane %v21_v8, %v49_v29  ;;  %v75_v35 = vrot.slane %v21_v8, %v74_v30  ;;  %v553_v29 = vmov 683565275  }
   0xc   :  { %67 = vperm.xlu1 %512, %v59_v11   ;;  %64 = vperm.xlu0 %511, %v58_v12   ;;  %p532_p3 = por %p531_p2, %p530_p1 }
   0xe   :  { %p533_p4 = pnand %p532_p3, %p526_p0 }
  0x10   :  { %89 = vperm.xlu1 %512, %v80_v13   ;;  %84 = vperm.xlu0 %511, %v79_v14   ;;  %v550_v14 = vmov 920167782  }
  0x14   :  { %105 = vperm.xlu1 %512, %v100_v15   ;;  %94 = vperm.xlu0 %511, %v81_v16  }
  0x18   :  { %115 = vperm.xlu1 %512, %v102_v17   ;;  %110 = vperm.xlu0 %511, %v101_v18   ;;  %v551_v18 = vmov 1326507024  }
  0x1c   :  { %443 = vperm.xlu1 %512, %v434_v19   ;;  %438 = vperm.xlu0 %511, %v433_v20  }
  0x20   :  { %448 = vperm.xlu0 %511, %v435_v21  }
  0x83   :  { %v39_v23 = vpop.permute.xlu1 %38  ;;  %v33_v24 = vpop.permute.xlu0 %32 }
  0x84   :  { %vm40_vm6 = vcmp.eq.s32.totalorder %v33_v24, 1  ;;  %vm42_vm8 = vcmp.eq.s32.totalorder %v39_v23, 1 }
  0x85   :  { %v51_v38 = vsel %vm40_vm6, %v46_v33, %v50_v34  ;;  %v53_v43 = vsel %vm42_vm8, %v46_v33, %v50_v34 }
  0x87   :  { %v62_v26 = vpop.permute.xlu1 %61  ;;  %v36_v27 = vpop.permute.xlu0 %35 }
  0x88   :  { %vm69_vm7 = vcmp.eq.s32.totalorder %v62_v26, 1  ;;  %vm41_vm9 = vcmp.eq.s32.totalorder %v36_v27, 1  ;;  %v552_v26 = vmov 2102212464  }
  0x89   :  { %v76_v39 = vsel %vm69_vm7, %v75_v35, %v51_v38  ;;  %v52_v44 = vsel %vm41_vm9, %v46_v33, %v50_v34  ;;  %v554_v34 = vmov 2475754826  }
  0x8b   :  { %v68_v31 = vpop.permute.xlu1 %67  ;;  %v65_v32 = vpop.permute.xlu0 %64 }
  0x8c   :  { %vm71_vm10 = vcmp.eq.s32.totalorder %v68_v31, 1  ;;  %vm70_vm11 = vcmp.eq.s32.totalorder %v65_v32, 1 }
  0x8d   :  { %v77_v46 = vsel %vm70_vm11, %v75_v35, %v52_v44  ;;  %v78_v47 = vsel %vm71_vm10, %v75_v35, %v53_v43 }
  0x8f   :  { %v90_v36 = vpop.permute.xlu1 %89  ;;  %v85_v37 = vpop.permute.xlu0 %84 }
  0x90   :  { %v97_v40 = vmul.f32 %v85_v37, %v76_v39  ;;  %v98_v48 = vmul.f32 %v90_v36, %v77_v46 }
  0x93   :  { %v106_v41 = vpop.permute.xlu1 %105  ;;  %v95_v42 = vpop.permute.xlu0 %94 }
  0x94   :  { %v628_v45 = vadd.f32 %v106_v41, %v97_v40  ;;  %v99_v50 = vmul.f32 %v95_v42, %v78_v47 }
  0x96   :  { %v124_v49 = vand.u32 2139095040, %v628_v45  ;;  %v121_v53 = vand.u32 2147483647, %v628_v45 }
  0x97   :  { %v116_v51 = vpop.permute.xlu1 %115  ;;  %v111_v52 = vpop.permute.xlu0 %110 }
  0x98   :  { %v125_v54 = vshrl.u32 %v124_v49, 23  ;;  %v632_v55 = vadd.f32 %v116_v51, %v99_v50  ;;  %v634_v56 = vadd.f32 %v111_v52, %v98_v48  ;;  %v128_v61 = vand.u32 8388607, %v121_v53 }
  0x9a   :  { %v476_v57 = vadd.s32 4294967169, %v125_v54  ;;  %v332_v58 = vand.u32 2139095040, %v632_v55  ;;  %v228_v59 = vand.u32 2139095040, %v634_v56  ;;  %v225_v60 = vand.u32 2147483647, %v634_v56 }
  0x9b   :  { %v329_v2 = vand.u32 2147483647, %v632_v55  ;;  %v129_v6 = vor.u32 8388608, %v128_v61 }
  0x9c   :  { %v131_v62 = vadd.s32 1, %v476_v57  ;;  %v333_v63 = vshrl.u32 %v332_v58, 23  ;;  %v229_v0 = vshrl.u32 %v228_v59, 23  ;;  %v232_v1 = vand.u32 8388607, %v225_v60 }
  0x9d   :  { %v648_v11 = vand.u32 8388607, %v329_v2  ;;  %v656_v16 = vshll.u32 %v129_v6, 8  ;;  %v555_v58 = vmov 2131351028  }
  0x9e   :  { %vm132_vm12 = vcmp.gt.s32.totalorder %v131_v62, 0  ;;  %v484_v3 = vadd.s32 4294967169, %v333_v63  ;;  %v480_v5 = vadd.s32 4294967169, %v229_v0  ;;  %v233_v10 = vor.u32 8388608, %v232_v1 }
  0x9f   :  { %v133_v4 = vsel %vm132_vm12, %v131_v62, 0  ;;  %v337_v25 = vor.u32 8388608, %v648_v11 }
  0xa0   :  { %v644_v7 = vand.u32 31, %v133_v4  ;;  %v339_v8 = vadd.s32 1, %v484_v3  ;;  %v235_v9 = vadd.s32 1, %v480_v5  ;;  %v650_v12 = vshrl.u32 %v133_v4, 5 }
  0xa1   :  { %v662_v24 = vshll.u32 %v233_v10, 8 }
  0xa2   :  { %v653_v13 = vsub.s32 32, %v644_v7  ;;  %v150_v15 = vshll.u32 %v550_v14, %v644_v7  ;;  %vm340_vm13 = vcmp.gt.s32.totalorder %v339_v8, 0  ;;  %vm236_vm14 = vcmp.gt.s32.totalorder %v235_v9, 0 }
  0xa3   :  { %v341_v20 = vsel %vm340_vm13, %v339_v8, 0  ;;  %v237_v21 = vsel %vm236_vm14, %v235_v9, 0  ;;  %v147_v27 = vshll.u32 %v552_v26, %v644_v7  ;;  %vm156_vm15 = vcmp.lt.s32.totalorder %v650_v12, 4 }
  0xa4   :  { %v148_v17 = vshrl.u32 %v550_v14, %v653_v13  ;;  %v151_v19 = vshrl.u32 %v551_v18, %v653_v13  ;;  %v660_v22 = vand.u32 31, %v341_v20  ;;  %v239_v23 = vand.u32 31, %v237_v21 }
  0xa5   :  { %v138_v30 = vshll.u32 %v553_v29, %v644_v7  ;;  %v670_v31 = vshrl.u32 %v341_v20, 5  ;;  %v238_v33 = vshrl.u32 %v237_v21, 5  ;;  %v141_v35 = vshll.u32 %v554_v34, %v644_v7 }
  0xa6   :  { %v152_v28 = vor.u32 %v151_v19, %v150_v15  ;;  %v673_v32 = vsub.s32 32, %v660_v22  ;;  %v149_v36 = vor.u32 %v148_v17, %v147_v27  ;;  %v240_v37 = vsub.s32 32, %v239_v23 }
  0xa7   :  { %v137_v38 = vshrl.u32 %v553_v29, %v653_v13  ;;  %v139_v39 = vshrl.u32 %v554_v34, %v653_v13  ;;  %v355_v41 = vshll.u32 %v552_v26, %v660_v22  ;;  %v686_v42 = vshll.u32 %v550_v14, %v660_v22 }
  0xa8   :  { %v166_v40 = vsel %vm156_vm15, %v152_v28, 1326507024  ;;  %v251_v43 = vshll.u32 %v552_v26, %v239_v23  ;;  %v356_v44 = vshrl.u32 %v550_v14, %v673_v32  ;;  %v252_v46 = vshrl.u32 %v550_v14, %v240_v37 }
  0xa9   :  { %v254_v47 = vshll.u32 %v550_v14, %v239_v23  ;;  %v255_v48 = vshrl.u32 %v551_v18, %v240_v37  ;;  %v691_v49 = vshrl.u32 %v551_v18, %v673_v32  ;;  %vm260_vm0 = vcmp.lt.s32.totalorder %v238_v33, 4 }
  0xaa   :  { %v242_v50 = vshll.u32 %v553_v29, %v239_v23  ;;  %v243_v51 = vshrl.u32 %v554_v34, %v240_v37  ;;  %v253_v52 = vor.u32 %v252_v46, %v251_v43  ;;  %v245_v57 = vshll.u32 %v554_v34, %v239_v23 }
  0xab   :  { %v256_v54 = vor.u32 %v255_v48, %v254_v47  ;;  %v246_v59 = vshrl.u32 %v555_v58, %v240_v37  ;;  %v241_v61 = vshrl.u32 %v553_v29, %v240_v37  ;;  %v248_v63 = vshll.u32 %v555_v58, %v239_v23 }
  0xac   :  { %v244_v62 = vor.u32 %v243_v51, %v242_v50  ;;  %v249_v0 = vshrl.u32 %v552_v26, %v240_v37  ;;  %v266_v1 = vsel %vm260_vm0, %v253_v52, 920167782  ;;  %vm257_vm1 = vcmp.lt.s32.totalorder %v238_v33, 1 }
  0xad   :  { %v270_v3 = vsel %vm260_vm0, %v256_v54, 1326507024  ;;  %v247_v4 = vor.u32 %v246_v59, %v245_v57  ;;  %vm258_vm2 = vcmp.lt.s32.totalorder %v238_v33, 2  ;;  %vm259_vm3 = vcmp.lt.s32.totalorder %v238_v33, 3 }
  0xae   :  { %v250_v5 = vor.u32 %v249_v0, %v248_v63  ;;  %v261_v6 = vsel %vm257_vm1, %v241_v61, %v244_v62  ;;  %v271_v9 = vsel %vm259_vm3, %v253_v52, %v270_v3  ;;  %v140_v10 = vor.u32 %v139_v39, %v138_v30 }
  0xaf   :  { %v265_v8 = vsel %vm257_vm1, %v244_v62, %v247_v4  ;;  %v142_v14 = vshrl.u32 %v555_v58, %v653_v13  ;;  %v144_v19 = vshll.u32 %v555_v58, %v644_v7  ;;  %vm364_vm4 = vcmp.lt.s32.totalorder %v670_v31, 4 }
  0xb0   :  { %v262_v15 = vsel %vm260_vm0, %v250_v5, 2102212464  ;;  %v267_v17 = vsel %vm259_vm3, %v250_v5, %v266_v1  ;;  %v269_v18 = vsel %vm257_vm1, %v247_v4, %v250_v5  ;;  %v145_v39 = vshrl.u32 %v552_v26, %v653_v13 }
  0xb1   :  { %v263_v20 = vsel %vm259_vm3, %v247_v4, %v262_v15  ;;  %v268_v21 = vsel %vm258_vm2, %v265_v8, %v267_v17  ;;  %v272_v23 = vsel %vm258_vm2, %v269_v18, %v271_v9  ;;  %v143_v27 = vor.u32 %v142_v14, %v141_v35 }
  0xb2   :  { %v264_v28 = vsel %vm258_vm2, %v261_v6, %v263_v20  ;;  %v712_v30 = vmul.u32.u64.low %v662_v24, %v272_v23  ;;  %v713_v37 = vmul.u32.u64.high %v662_v24, %v272_v23, %v712_v30  ;;  %v162_v7 = vsel %vm156_vm15, %v149_v36, 920167782 }
  0xb3   :  { %v357_v43 = vor.u32 %v356_v44, %v355_v41  ;;  %v720_v46 = vmul.u32.u64.low %v662_v24, %v268_v21  ;;  %v721_v47 = vmul.u32.u64.high %v662_v24, %v268_v21, %v720_v46  ;;  %v360_v33 = vor.u32 %v691_v49, %v686_v42 }
  0xb4   :  { %v146_v35 = vor.u32 %v145_v39, %v144_v19  ;;  %vm153_vm5 = vcmp.lt.s32.totalorder %v650_v12, 1  ;;  %vm155_vm6 = vcmp.lt.s32.totalorder %v650_v12, 3  ;;  %v280_v48 = vmul.u32 %v662_v24, %v264_v28 }
  0xb5   :  { %vm154_vm7 = vcmp.lt.s32.totalorder %v650_v12, 2  ;;  %v161_v13 = vsel %vm153_vm5, %v140_v10, %v143_v27  ;;  %v167_v50 = vsel %vm155_vm6, %v149_v36, %v166_v40  ;;  %vm282_vm8 = vc.u32 %v713_v37, %v720_v46 }
  0xb6   :  { %v157_v41 = vsel %vm153_vm5, %v137_v38, %v140_v10  ;;  %v158_v44 = vsel %vm156_vm15, %v146_v35, 2102212464  ;;  %v163_v51 = vsel %vm155_vm6, %v146_v35, %v162_v7  ;;  %v283_v42 = vadd.s32 1, %v721_v47 }
  0xb7   :  { %v159_v49 = vsel %vm155_vm6, %v143_v27, %v158_v44  ;;  %v164_v52 = vsel %vm154_vm7, %v161_v13, %v163_v51  ;;  %v165_v54 = vsel %vm153_vm5, %v143_v27, %v146_v35  ;;  %v346_v36 = vshll.u32 %v553_v29, %v660_v22 }
  0xb8   :  { %v168_v57 = vsel %vm154_vm7, %v165_v54, %v167_v50  ;;  %v736_v24 = vmul.u32.u64.low %v656_v16, %v164_v52  ;;  %v737_v59 = vmul.u32.u64.high %v656_v16, %v164_v52, %v736_v24  ;;  %v284_v38 = vsel %vm282_vm8, %v283_v42, %v721_v47 }
  0xb9   :  { %v160_v40 = vsel %vm154_vm7, %v157_v41, %v159_v49  ;;  %v744_v12 = vmul.u32.u64.low %v656_v16, %v168_v57  ;;  %v745_v61 = vmul.u32.u64.high %v656_v16, %v168_v57, %v744_v12  ;;  %v285_v62 = vadd.s32 %v284_v38, %v280_v48 }
  0xba   :  { %v347_v63 = vshrl.u32 %v554_v34, %v673_v32  ;;  %v349_v0 = vshll.u32 %v554_v34, %v660_v22  ;;  %v350_v1 = vshrl.u32 %v555_v58, %v673_v32  ;;  %v370_v3 = vsel %vm364_vm4, %v357_v43, 920167782 }
  0xbb   :  { %v374_v4 = vsel %vm364_vm4, %v360_v33, 1326507024  ;;  %v352_v5 = vshll.u32 %v555_v58, %v660_v22  ;;  %v353_v6 = vshrl.u32 %v552_v26, %v673_v32  ;;  %v286_v8 = vadd.s32 536870912, %v285_v62 }
  0xbc   :  { %v179_v9 = vadd.s32 1, %v737_v59  ;;  %v348_v10 = vor.u32 %v347_v63, %v346_v36  ;;  %v351_v34 = vor.u32 %v350_v1, %v349_v0  ;;  %v176_v14 = vmul.u32 %v656_v16, %v160_v40 }
  0xbd   :  { %vm178_vm9 = vc.u32 %v745_v61, %v736_v24  ;;  %v354_v15 = vor.u32 %v353_v6, %v352_v5  ;;  %vm361_vm10 = vcmp.lt.s32.totalorder %v670_v31, 1  ;;  %v766_v17 = vshrl.u32 %v286_v8, 30 }
  0xbe   :  { %v180_v22 = vsel %vm178_vm9, %v179_v9, %v737_v59  ;;  %vm363_vm11 = vcmp.lt.s32.totalorder %v670_v31, 3  ;;  %v369_v26 = vsel %vm361_vm10, %v348_v10, %v351_v34  ;;  %v345_v20 = vshrl.u32 %v553_v29, %v673_v32 }
  0xbf   :  { %v181_v58 = vadd.s32 %v180_v22, %v176_v14  ;;  %v371_v18 = vsel %vm363_vm11, %v354_v15, %v370_v3  ;;  %v373_v16 = vsel %vm361_vm10, %v351_v34, %v354_v15  ;;  %v288_v19 = vshll.u32 %v766_v17, 30 }
  0xc0   :  { %vm362_vm12 = vcmp.lt.s32.totalorder %v670_v31, 2  ;;  %v366_v21 = vsel %vm364_vm4, %v354_v15, 2102212464  ;;  %v375_v28 = vsel %vm363_vm11, %v357_v43, %v374_v4  ;;  %v377_v30 = vshll.u32 %v337_v25, 8 }
  0xc1   :  { %v182_v23 = vadd.s32 536870912, %v181_v58  ;;  %v372_v27 = vsel %vm362_vm12, %v369_v26, %v371_v18  ;;  %v289_v39 = vsub.s32 %v285_v62, %v288_v19  ;;  %v376_v7 = vsel %vm362_vm12, %v373_v16, %v375_v28 }
  0xc2   :  { %v365_v32 = vsel %vm361_vm10, %v345_v20, %v348_v10  ;;  %v794_v47 = vmul.u32.u64.low %v377_v30, %v376_v7  ;;  %v795_v33 = vmul.u32.u64.high %v377_v30, %v376_v7, %v794_v47  ;;  %v367_v48 = vsel %vm363_vm11, %v351_v34, %v366_v21 }
  0xc3   :  { %v790_v29 = vshrl.u32 %v182_v23, 30  ;;  %v291_v35 = vsub.s32 0, %v289_v39  ;;  %v799_v43 = vmul.u32.u64.low %v377_v30, %v372_v27  ;;  %v800_v13 = vmul.u32.u64.high %v377_v30, %v372_v27, %v799_v43 }
  0xc4   :  { %v368_v41 = vsel %vm362_vm12, %v365_v32, %v367_v48  ;;  %v281_v31 = vadd.s32 %v720_v46, %v713_v37  ;;  %v177_v9 = vadd.s32 %v736_v24, %v745_v61  ;;  %v311_v16 = vsub.s32 4, %v766_v17 }
  0xc5   :  { %v184_v11 = vshll.u32 %v790_v29, 30  ;;  %v481_v25 = vmin.u32 %v291_v35, %v289_v39  ;;  %vm386_vm13 = vc.u32 %v795_v33, %v799_v43  ;;  %v387_v42 = vadd.s32 1, %v800_v13 }
  0xc6   :  { %v384_v52 = vmul.u32 %v377_v30, %v368_v41  ;;  %vm227_vm0 = vcmp.lt.s32.totalorder %v634_v56, 0  ;;  %v207_v7 = vsub.s32 4, %v790_v29  ;;  %vm823_vm1 = vcmp.le.f32.partialorder %v225_v60, 0.7853982 }
  0xc7   :  { %v185_v50 = vsub.s32 %v181_v58, %v184_v11  ;;  %v293_v44 = vclz %v481_v25  ;;  %v388_v57 = vsel %vm386_vm13, %v387_v42, %v800_v13  ;;  %v312_v28 = vsel %vm227_vm0, %v311_v16, %v766_v17 }
  0xc8   :  { %v389_v59 = vadd.s32 %v388_v57, %v384_v52  ;;  %vm123_vm2 = vcmp.lt.s32.totalorder %v628_v45, 0  ;;  %v314_v17 = vsel %vm823_vm1, 0, %v312_v28  ;;  %vm836_vm4 = vcmp.le.f32.partialorder %v121_v53, 0.7853982 }
  0xc9   :  { %v187_v51 = vsub.s32 0, %v185_v50  ;;  %v482_v49 = vadd.s32 4294967294, %v293_v44  ;;  %v208_v60 = vsel %vm123_vm2, %v207_v7, %v790_v29  ;;  %v318_v52 = vadd.s32 3, %v314_v17 }
  0xca   :  { %v390_v63 = vadd.s32 536870912, %v389_v59  ;;  %v210_v29 = vsel %vm836_vm4, 0, %v208_v60  ;;  %vm331_vm8 = vcmp.lt.s32.totalorder %v632_v55, 0  ;;  %vm317_vm9 = vweird.f32 %v634_v56 }
  0xcb   :  { %v477_v54 = vmin.u32 %v187_v51, %v185_v50  ;;  %vm483_vm14 = vcmp.lt.s32.totalorder %v482_v49, 0  ;;  %v385_v51 = vadd.s32 %v799_v43, %v795_v33  ;;  %vm852_vm11 = vcmp.le.f32.partialorder %v329_v2, 0.7853982 }
  0xcc   :  { %v296_v36 = vsel %vm483_vm14, 0, %v482_v49  ;;  %v812_v4 = vshrl.u32 %v390_v63, 30  ;;  %vm213_vm14 = vweird.f32 %v628_v45 }
  0xcd   :  { %v189_v38 = vclz %v477_v54  ;;  %v297_v40 = vsub.s32 32, %v296_v36  ;;  %v301_v12 = vsub.s32 4294967266, %v296_v36  ;;  %v298_v0 = vshll.u32 %v289_v39, %v296_v36 }
  0xce   :  { %v392_v37 = vshll.u32 %v812_v4, 30 }
  0xcf   :  { %v478_v62 = vadd.s32 4294967294, %v189_v38  ;;  %v299_v1 = vshrl.u32 %v281_v31, %v297_v40  ;;  %v302_v3 = vadd.s32 127, %v301_v12  ;;  %v319_v31 = vand.u32 3, %v318_v52 }
  0xd0   :  { %v393_v26 = vsub.s32 %v389_v59, %v392_v37  ;;  %v214_v40 = vadd.s32 3, %v210_v29 }
  0xd1   :  { %vm479_vm15 = vcmp.lt.s32.totalorder %v478_v62, 0  ;;  %v300_v5 = vor.u32 %v299_v1, %v298_v0  ;;  %v303_v6 = vshll.u32 %v302_v3, 23  ;;  %vm324_vm5 = vcmp.eq.s32.totalorder %v319_v31, 2 }
  0xd2   :  { %v192_v8 = vsel %vm479_vm15, 0, %v478_v62  ;;  %v395_v21 = vsub.s32 0, %v393_v26  ;;  %v215_v3 = vand.u32 3, %v214_v40  ;;  %vm321_vm6 = vcmp.eq.s32.totalorder %v319_v31, 0 }
  0xd3   :  { %v193_v10 = vsub.s32 32, %v192_v8  ;;  %v197_v34 = vsub.s32 4294967266, %v192_v8  ;;  %v304_v46 = vor.u32 4788187, %v303_v6  ;;  %v194_v14 = vshll.u32 %v185_v50, %v192_v8 }
  0xd4   :  { %v307_v18 = vcvt.s32.f32 %v300_v5  ;;  %v485_v61 = vmin.u32 %v395_v21, %v393_v26  ;;  %v415_v8 = vsub.s32 4, %v812_v4  ;;  %vm320_vm7 = vcmp.lt.s32.totalorder %v319_v31, 2 }
  0xd5   :  { %v195_v15 = vshrl.u32 %v177_v9, %v193_v10  ;;  %v198_v22 = vadd.s32 127, %v197_v34  ;;  %v305_v58 = vand.u32 2147483647, %v304_v46  ;;  %vm220_vm10 = vcmp.eq.s32.totalorder %v215_v3, 2 }
  0xd6   :  { %v397_v32 = vclz %v485_v61  ;;  %vm217_vm12 = vcmp.eq.s32.totalorder %v215_v3, 0  ;;  %vm216_vm13 = vcmp.lt.s32.totalorder %v215_v3, 2 }
  0xd7   :  { %v196_v19 = vor.u32 %v195_v15, %v194_v14  ;;  %v199_v20 = vshll.u32 %v198_v22, 23  ;;  %v308_v23 = vmul.f32 %v307_v18, %v305_v58  ;;  %v444_v14 = vpop.permute.xlu1 %443 }
  0xd8   :  { %v486_v11 = vadd.s32 4294967294, %v397_v32 }
  0xd9   :  { %v200_v24 = vor.u32 4788187, %v199_v20  ;;  %v309_v27 = vxor.u32 2147483648, %v308_v23  ;;  %v203_v39 = vcvt.s32.f32 %v196_v19  ;;  %v416_v19 = vsel %vm331_vm8, %v415_v8, %v812_v4 }
  0xda   :  { %vm487_vm3 = vcmp.lt.s32.totalorder %v486_v11, 0 }
  0xdb   :  { %v201_v30 = vand.u32 2147483647, %v200_v24  ;;  %v310_v35 = vsel %vm227_vm0, %v309_v27, %v308_v23  ;;  %v400_v41 = vsel %vm487_vm3, 0, %v486_v11  ;;  %v418_v23 = vsel %vm852_vm11, 0, %v416_v19  ;;  %v439_v24 = vpop.permute.xlu0 %438 }
  0xdc   :  { %v313_v48 = vsel %vm823_vm1, %v634_v56, %v310_v35  ;;  %v401_v42 = vsub.s32 32, %v400_v41  ;;  %v405_v49 = vsub.s32 4294967266, %v400_v41  ;;  %v402_v53 = vshll.u32 %v393_v26, %v400_v41 }
  0xdd   :  { %v204_v13 = vmul.f32 %v203_v39, %v201_v30  ;;  %513 = vcosq.f32 %v313_v48  ;;  %v422_v27 = vadd.s32 3, %v418_v23 }
  0xde   :  { %515 = vsinq.f32 %v313_v48  ;;  %v403_v57 = vshrl.u32 %v385_v51, %v401_v42  ;;  %v406_v59 = vadd.s32 127, %v405_v49 }
  0xdf   :  { %v205_v25 = vxor.u32 2147483648, %v204_v13  ;;  %v423_v28 = vand.u32 3, %v422_v27  ;;  %v449_v48 = vpop.permute.xlu0 %448 }
  0xe0   :  { %v404_v36 = vor.u32 %v403_v57, %v402_v53  ;;  %v407_v38 = vshll.u32 %v406_v59, 23 }
  0xe1   :  { %v206_v44 = vsel %vm123_vm2, %v205_v25, %v204_v13  ;;  %vm428_vm15 = vcmp.eq.s32.totalorder %v423_v28, 2  ;;  %vm425_vm0 = vcmp.eq.s32.totalorder %v423_v28, 0  ;;  %vm424_vm1 = vcmp.lt.s32.totalorder %v423_v28, 2 }
  0xe2   :  { %v209_v54 = vsel %vm836_vm4, %v628_v45, %v206_v44  ;;  %v408_v33 = vor.u32 4788187, %v407_v38  ;;  %v411_v0 = vcvt.s32.f32 %v404_v36  ;;  %vm421_vm2 = vweird.f32 %v632_v55 }
  0xe3   :  { %517 = vcosq.f32 %v209_v54 }
  0xe4   :  { %519 = vsinq.f32 %v209_v54  ;;  %v409_v63 = vand.u32 2147483647, %v408_v33 }
  0xe6   :  { %v412_v6 = vmul.f32 %v411_v0, %v409_v63 }
  0xe7   :  { %v514_v43 = vpop.eup %513 }
  0xe8   :  { %v516_v12 = vpop.eup %515  ;;  %v325_v62 = vxor.u32 2147483648, %v514_v43  ;;  %v413_v37 = vxor.u32 2147483648, %v412_v6 }
  0xe9   :  { %v322_v1 = vxor.u32 2147483648, %v516_v12 }
  0xea   :  { %v326_v5 = vsel %vm324_vm5, %v325_v62, %v516_v12  ;;  %v414_v16 = vsel %vm331_vm8, %v413_v37, %v412_v6 }
  0xeb   :  { %v323_v9 = vsel %vm321_vm6, %v514_v43, %v322_v1  ;;  %v417_v20 = vsel %vm852_vm11, %v632_v55, %v414_v16 }
  0xec   :  { %v327_v34 = vsel %vm320_vm7, %v323_v9, %v326_v5  ;;  %521 = vcosq.f32 %v417_v20 }
  0xed   :  { %v518_v10 = vpop.eup %517  ;;  %v328_v15 = vsel %vm317_vm9, nan, %v327_v34  ;;  %523 = vsinq.f32 %v417_v20 }
  0xee   :  { %v520_v46 = vpop.eup %519  ;;  %v221_v22 = vxor.u32 2147483648, %v518_v10  ;;  %v452_v58 = vmul.f32 %v444_v14, %v328_v15 }
  0xef   :  { %v218_v18 = vxor.u32 2147483648, %v520_v46 }
  0xf0   :  { %v222_v56 = vsel %vm220_vm10, %v221_v22, %v520_v46  ;;  %455 = vst [vmem:[#allocation2 + $0x8] sm:$0xff] %v452_v58 }
  0xf1   :  { %v219_v21 = vsel %vm217_vm12, %v518_v10, %v218_v18 }
  0xf2   :  { %v223_v2 = vsel %vm216_vm13, %v219_v21, %v222_v56 }
  0xf3   :  { %v224_v61 = vsel %vm213_vm14, nan, %v223_v2 }
  0xf4   :  { %v451_v4 = vmul.f32 %v439_v24, %v224_v61 }
  0xf6   :  { %454 = vst [vmem:[#allocation2] sm:$0xff] %v451_v4  ;;  %v522_v30 = vpop.eup %521 }
  0xf7   :  { %v524_v39 = vpop.eup %523  ;;  %v429_v7 = vxor.u32 2147483648, %v522_v30 }
  0xf8   :  { %v426_v32 = vxor.u32 2147483648, %v524_v39 }
  0xf9   :  { %v430_v47 = vsel %vm428_vm15, %v429_v7, %v524_v39 }
  0xfa   :  { %v427_v45 = vsel %vm425_vm0, %v522_v30, %v426_v32 }
  0xfb   :  { %v431_v35 = vsel %vm424_vm1, %v427_v45, %v430_v47 }
  0xfc   :  { %v432_v13 = vsel %vm421_vm2, nan, %v431_v35 }
  0xfd   :  { %v453_v11 = vmul.f32 %v449_v48, %v432_v13 }
  0xff   :  { %456 = vst [vmem:[#allocation2 + $0x10] sm:$0xff] %v453_v11 }
 0x100   :  { %536 = shalt.err (!%p533_p4)
}
 0x101   :  { %s537_s19 = scalar_lea.hbm %s881_s5, 512 }
 0x102   :  { %p538_p5 = scmp.ne.s32.totalorder %s881_s5, %s537_s19  ;;  %p541_p6 = scmp.lt.u32.totalorder %s537_s19, %s881_s5 }
 0x104   :  { %p543_p7 = pnand %p541_p6, %p538_p5 }
 0x106   :  { %546 = shalt.err (!%p543_p7)
}
 0x107   :  { %s557_s24 = smov 128   ;;  %s558_s25 = smov 8  }
 0x108   :  { %471 = dma.vmem_to_hbm [thread:$0]  %s466_s4, 512, %s881_s5, [#allocation3], %s557_s24, %s557_s24, %s558_s25  }
 0x109   :  { %547 = dma.done.wait [#allocation3], 512  }
 0x10a   :  { %548 = vsyncadd [#allocation3], 4294966784 }
 0x10b   :  { %475 = vsyncpa [#allocation3], 1 }

</bundles_post_ra>
